<compile_context>
chip_gen: v7x
topology: tpu7x:2x2x1
jax: 0.10.0
libtpu: 0.0.40
codegen_flags: <defaults>
</compile_context>

<pallas_src>
import math
from functools import reduce

import jax
import jax.numpy as jnp
from jax.experimental import pallas as pl
from jax.experimental.pallas import tpu as pltpu


def _prod(xs):
    return reduce(lambda a, b: a * b, xs, 1)


def _sublane(dtype):
    """Sublane packing granularity for this dtype (rows per packed vreg)."""
    bits = jnp.dtype(dtype).itemsize * 8
    return max(8, (32 // bits) * 8)  # f32 -> 8, bf16 -> 16, int8/fp8 -> 32


_VMEM_BUDGET = 12 * 1024 * 1024  # fits v5e's 16 MiB scoped-VMEM default with headroom


def _choose_tile(n, bytes_per_unit, granule):
    """Largest tile (multiple of `granule`) whose double-buffered blocks fit the budget."""
    t = _VMEM_BUDGET // max(1, bytes_per_unit)
    t = (t // granule) * granule
    t = max(t, granule)
    if t >= n:
        return n  # full extent (always a legal block dim)
    return t


def _make_cat_kernel(sizes, cat_axis):
    """Copy each input block into its static slice of the output block."""
    def kernel(*refs):
        out_ref = refs[-1]
        off = 0
        for i, s in enumerate(sizes):
            if cat_axis == 1:                       # concat along lanes (last dim)
                out_ref[:, off:off + s] = refs[i][...]
            else:                                   # concat along sublanes (rows)
                out_ref[off:off + s, :] = refs[i][...]
            off += s
    return kernel


def cat_pallas(tensors, dim=0):
    """Pallas equivalent of torch.cat(tensors, dim)."""
    assert len(tensors) > 0, "Empty args for cat is invalid"
    tensors = [jnp.asarray(t) for t in tensors]
    ndim = tensors[0].ndim
    if dim < 0:
        dim += ndim
    ref_shape = tensors[0].shape
    for t in tensors:
        assert t.ndim == ndim, "all inputs must have the same rank"
        for ax in range(ndim):
            if ax != dim:
                assert t.shape[ax] == ref_shape[ax], "non-cat dims must match"

    dtype = jnp.result_type(*[t.dtype for t in tensors])
    out_cat = sum(t.shape[dim] for t in tensors)
    out_shape = list(ref_shape)
    out_shape[dim] = out_cat
    out_shape = tuple(out_shape)

    # torch.cat permits zero-sized entries along the concat dim; skip them.
    tensors = [t for t in tensors if t.shape[dim] > 0]

    outer = _prod(ref_shape[:dim])
    inner = _prod(ref_shape[dim + 1:])
    if not tensors or outer == 0 or inner == 0 or out_cat == 0:
        return jnp.zeros(out_shape, dtype)

    itemsize = jnp.dtype(dtype).itemsize
    cat_sizes = [t.shape[dim] for t in tensors]
    # Pure data movement: read every input byte once + write every output byte once.
    cost = pl.CostEstimate(
        flops=0, transcendentals=0,
        bytes_accessed=int(2 * outer * inner * out_cat * itemsize))

    if outer > 1:
        # --- general case: concat along the lane (last) axis, tile over rows ---
        widths = [c * inner for c in cat_sizes]
        total = sum(widths)
        flats = [t.astype(dtype).reshape(outer, w) for t, w in zip(tensors, widths)]

        tm = _choose_tile(outer, 4 * total * itemsize, _sublane(dtype))
        grid = (pl.cdiv(outer, tm),)
        in_specs = [pl.BlockSpec((tm, w), lambda i: (i, 0)) for w in widths]
        out_specs = pl.BlockSpec((tm, total), lambda i: (i, 0))
        kernel = _make_cat_kernel(widths, cat_axis=1)
        out2d_shape = (outer, total)
        blk_bytes = 4 * total * tm * itemsize          # 2x buffers * (inputs + output)
    else:
        # --- outer == 1 (e.g. dim == 0): row-stack, tile over columns ---
        rows = cat_sizes
        r_total = sum(rows)
        flats = [t.astype(dtype).reshape(r, inner) for t, r in zip(tensors, rows)]

        tn = _choose_tile(inner, 4 * r_total * itemsize, 128)
        grid = (pl.cdiv(inner, tn),)
        in_specs = [pl.BlockSpec((r, tn), lambda j: (0, j)) for r in rows]
        out_specs = pl.BlockSpec((r_total, tn), lambda j: (0, j))
        kernel = _make_cat_kernel(rows, cat_axis=0)
        out2d_shape = (r_total, inner)
        blk_bytes = 4 * r_total * tn * itemsize

    params = {"dimension_semantics": ("parallel",)}   # lets v7x split the grid over 2 TCs
    if blk_bytes > _VMEM_BUDGET:
        # Pathologically wide concat axis: give Mosaic a larger scoped-VMEM window.
        params["vmem_limit_bytes"] = int(min(64 * 2**20, blk_bytes + (4 << 20)))
    compiler_params = pltpu.CompilerParams(**params)

    out2d = pl.pallas_call(
        kernel,
        out_shape=jax.ShapeDtypeStruct(out2d_shape, dtype),
        grid=grid,
        in_specs=in_specs,
        out_specs=out_specs,
        compiler_params=compiler_params,
        cost_estimate=cost,
    )(*flats)

    return out2d.reshape(out_shape)


class CatLayer:
    """Mirror of the PyTorch CatLayer module (forward(*args) or forward([list]))."""

    def __init__(self, dim=0):
        self.dim = dim

    def __call__(self, *args):
        assert len(args) > 0, "Empty args for cat is invalid"
        if len(args) == 1 and isinstance(args[0], (list, tuple)):
            return cat_pallas(list(args[0]), dim=self.dim)
        return cat_pallas(list(args), dim=self.dim)


if __name__ == "__main__":
    key = jax.random.PRNGKey(0)
    k1, k2, k3 = jax.random.split(key, 3)

    # Small NCHW inputs; CatLayer(dim=1) concatenates along channels.
    x = jax.random.normal(k1, (2, 4, 16, 16), dtype=jnp.float32)
    y = jax.random.normal(k2, (2, 6, 16, 16), dtype=jnp.float32)
    z = jax.random.normal(k3, (2, 2, 16, 16), dtype=jnp.float32)

    cat1 = CatLayer(dim=1)
    out = jax.block_until_ready(cat1([x, y, z]))          # list-argument form
    ref = jnp.concatenate([x, y, z], axis=1)
    assert out.shape == ref.shape and out.dtype == ref.dtype
    assert jnp.allclose(out, ref), "dim=1 mismatch vs jnp.concatenate"

    # Module default dim=0: exercises the row-stacking (outer == 1) path.
    cat0 = CatLayer(dim=0)
    out0 = jax.block_until_ready(cat0(x, x))              # varargs form
    ref0 = jnp.concatenate([x, x], axis=0)
    assert out0.shape == ref0.shape
    assert jnp.allclose(out0, ref0), "dim=0 mismatch vs jnp.concatenate"

    # bf16 coverage (sublane packing = 16).
    xb = x.astype(jnp.bfloat16)
    yb = y.astype(jnp.bfloat16)
    outb = jax.block_until_ready(cat1([xb, yb]))
    refb = jnp.concatenate([xb, yb], axis=1)
    assert outb.dtype == refb.dtype and jnp.array_equal(outb, refb), "bf16 mismatch"

    print("KERNEL_OK")
</pallas_src>

<mosaic_0001>
module attributes {stable_mosaic.version = 11 : i64} {
  func.func @kernel(%arg0: i32, %arg1: memref<2x1024xf32, #tpu.memory_space<vmem>>, %arg2: memref<2x1536xf32, #tpu.memory_space<vmem>>, %arg3: memref<2x512xf32, #tpu.memory_space<vmem>>, %arg4: memref<2x3072xf32, #tpu.memory_space<vmem>>) attributes {dimension_semantics = [#tpu.dimension_semantics<parallel>], iteration_bounds = array<i64: 1>, scalar_prefetch = 0 : i64, scratch_operands = 0 : i64, tpu.core_type = #tpu.core_type<tc>, window_params = [{transform_indices = @transform_0, window_bounds = array<i64: 2, 1024>}, {transform_indices = @transform_1, window_bounds = array<i64: 2, 1536>}, {transform_indices = @transform_2, window_bounds = array<i64: 2, 512>}, {transform_indices = @transform_3, window_bounds = array<i64: 2, 3072>}]} {
    %c0 = arith.constant 0 : index
    %c0_0 = arith.constant 0 : index
    %0 = vector.load %arg1[%c0, %c0_0] : memref<2x1024xf32, #tpu.memory_space<vmem>>, vector<2x1024xf32>
    %c0_1 = arith.constant 0 : index
    %c0_2 = arith.constant 0 : index
    %1 = vector.load %arg4[%c0_1, %c0_2] : memref<2x3072xf32, #tpu.memory_space<vmem>>, vector<2x1024xf32>
    tpu.vector_store %arg4[%c0_1, %c0_2], %0 {strides = array<i32>} : memref<2x3072xf32, #tpu.memory_space<vmem>>, vector<2x1024xf32>,
    %c0_3 = arith.constant 0 : index
    %c0_4 = arith.constant 0 : index
    %2 = vector.load %arg2[%c0_3, %c0_4] : memref<2x1536xf32, #tpu.memory_space<vmem>>, vector<2x1536xf32>
    %c0_5 = arith.constant 0 : index
    %c1024 = arith.constant 1024 : index
    %3 = vector.load %arg4[%c0_5, %c1024] : memref<2x3072xf32, #tpu.memory_space<vmem>>, vector<2x1536xf32>
    tpu.vector_store %arg4[%c0_5, %c1024], %2 {strides = array<i32>} : memref<2x3072xf32, #tpu.memory_space<vmem>>, vector<2x1536xf32>,
    %c0_6 = arith.constant 0 : index
    %c0_7 = arith.constant 0 : index
    %4 = vector.load %arg3[%c0_6, %c0_7] : memref<2x512xf32, #tpu.memory_space<vmem>>, vector<2x512xf32>
    %c0_8 = arith.constant 0 : index
    %c2560 = arith.constant 2560 : index
    %5 = vector.load %arg4[%c0_8, %c2560] : memref<2x3072xf32, #tpu.memory_space<vmem>>, vector<2x512xf32>
    tpu.vector_store %arg4[%c0_8, %c2560], %4 {strides = array<i32>} : memref<2x3072xf32, #tpu.memory_space<vmem>>, vector<2x512xf32>,
    return
  }
  func.func @transform_0(%arg0: i32) -> (i32, i32) {
    %c0_i32 = arith.constant 0 : i32
    %c0_i32_0 = arith.constant 0 : i32
    return %arg0, %c0_i32 : i32, i32
  }
  func.func @transform_1(%arg0: i32) -> (i32, i32) {
    %c0_i32 = arith.constant 0 : i32
    %c0_i32_0 = arith.constant 0 : i32
    return %arg0, %c0_i32 : i32, i32
  }
  func.func @transform_2(%arg0: i32) -> (i32, i32) {
    %c0_i32 = arith.constant 0 : i32
    %c0_i32_0 = arith.constant 0 : i32
    return %arg0, %c0_i32 : i32, i32
  }
  func.func @transform_3(%arg0: i32) -> (i32, i32) {
    %c0_i32 = arith.constant 0 : i32
    %c0_i32_0 = arith.constant 0 : i32
    return %arg0, %c0_i32 : i32, i32
  }
}

</mosaic_0001>

<bundles_post_ra>
// kernel: tpu_custom_call.1
= control target key start
LH: loop header
LB: loop body
LE: loop exit
PB: predicated region body
PF: predicated region fallthrough
CT: control target
= control target key end

     0   :  { %8 = vsyncpa [#allocation3], 0  ;;  %s248_s0 = inlined_call_operand.hbm [shape: f32[2,1024], index: 0, kind: input, shape index: {}]   ;;  %s249_s1 = inlined_call_operand.hbm [shape: f32[2,1536], index: 1, kind: input, shape index: {}]   ;;  %s250_s2 = inlined_call_operand.hbm [shape: f32[2,512], index: 2, kind: input, shape index: {}]   ;;  %s251_s3 = inlined_call_operand.hbm [shape: f32[2,3072], index: 3, kind: output, shape index: {}]  }
   0x1   :  { %9 = vsyncpa [#allocation6], 0 }
   0x2   :  { %10 = vsyncpa [#allocation4], 0  ;;  %s176_s12 = smov [#allocation5]   ;;  %s177_s14 = smov [#allocation2]  }
   0x3   :  { %s27_s13 = sshll.u32 %s176_s12, 4  ;;  %s17_s15 = sshll.u32 %s177_s14, 4  ;;  %s28_s13 = int_to_ptr.vmem [resolvable:$true] %s27_s13  ;;  %s18_s15 = int_to_ptr.vmem [resolvable:$true] %s17_s15 }
   0x4   :  { %s82_s18 = scalar_lea.hbm %s249_s1, 384 }
   0x5   :  { %p83_p0 = scmp.ne.s32.totalorder %s249_s1, %s82_s18  ;;  %p86_p1 = scmp.lt.u32.totalorder %s82_s18, %s249_s1 }
   0x7   :  { %p88_p2 = pnand %p86_p1, %p83_p0 }
   0x9   :  { %91 = shalt.err (!%p88_p2)
}
   0xa   :  { %s92_s23 = scalar_lea.vmem %s28_s13, 384  ;;  %p97_p4 = scmp.lt.s32.totalorder %s28_s13, %s28_s13 }
   0xb   :  { %p93_p3 = scmp.ne.s32.totalorder %s28_s13, %s92_s23  ;;  %p98_p5 = scmp.lt.s32.totalorder %s92_s23, %s92_s23 }
   0xd   :  { %p99_p6 = por %p98_p5, %p97_p4 }
   0xf   :  { %p100_p7 = pnand %p99_p6, %p93_p3 }
  0x11   :  { %103 = shalt.err (!%p100_p7)
}
  0x12   :  { %30 = dma.hbm_to_vmem [thread:$0]  %s249_s1, 384, %s28_s13, [#allocation6]  }
  0x13   :  { %s104_s28 = scalar_lea.hbm %s248_s0, 256 }
  0x14   :  { %p105_p8 = scmp.ne.s32.totalorder %s248_s0, %s104_s28  ;;  %p108_p9 = scmp.lt.u32.totalorder %s104_s28, %s248_s0 }
  0x16   :  { %p110_p10 = pnand %p108_p9, %p105_p8 }
  0x18   :  { %113 = shalt.err (!%p110_p10)
}
  0x19   :  { %s114_s6 = scalar_lea.vmem %s18_s15, 256  ;;  %p119_p12 = scmp.lt.s32.totalorder %s18_s15, %s18_s15 }
  0x1a   :  { %p115_p11 = scmp.ne.s32.totalorder %s18_s15, %s114_s6  ;;  %p120_p13 = scmp.lt.s32.totalorder %s114_s6, %s114_s6 }
  0x1c   :  { %p121_p0 = por %p120_p13, %p119_p12 }
  0x1e   :  { %p122_p1 = pnand %p121_p0, %p115_p11 }
  0x20   :  { %125 = shalt.err (!%p122_p1)
}
  0x21   :  { %20 = dma.hbm_to_vmem [thread:$0]  %s248_s0, 256, %s18_s15, [#allocation3]  }
  0x22   :  { %s178_s8 = smov [#allocation7]   ;;  %s126_s12 = scalar_lea.hbm %s250_s2, 128 }
  0x23   :  { %s37_s9 = sshll.u32 %s178_s8, 4  ;;  %p127_p2 = scmp.ne.s32.totalorder %s250_s2, %s126_s12  ;;  %s38_s9 = int_to_ptr.vmem [resolvable:$true] %s37_s9 }
  0x24   :  { %p130_p3 = scmp.lt.u32.totalorder %s126_s12, %s250_s2 }
  0x26   :  { %p132_p4 = pnand %p130_p3, %p127_p2 }
  0x28   :  { %135 = shalt.err (!%p132_p4)
}
  0x29   :  { %s136_s18 = scalar_lea.vmem %s38_s9, 128  ;;  %p141_p6 = scmp.lt.s32.totalorder %s38_s9, %s38_s9 }
  0x2a   :  { %p137_p5 = scmp.ne.s32.totalorder %s38_s9, %s136_s18  ;;  %p142_p7 = scmp.lt.s32.totalorder %s136_s18, %s136_s18 }
  0x2c   :  { %p143_p8 = por %p142_p7, %p141_p6 }
  0x2e   :  { %p144_p9 = pnand %p143_p8, %p137_p5 }
  0x30   :  { %147 = shalt.err (!%p144_p9)
}
  0x31   :  { %40 = dma.hbm_to_vmem [thread:$0]  %s250_s2, 128, %s38_s9, [#allocation6]  }
  0x32   :  { %170 = dma.done.wait [#allocation3], 256  }
  0x33   :  { %171 = vsyncadd [#allocation3], 4294967040 }
  0x34   :  { %172 = dma.done.wait [#allocation6], 512  }
  0x35   :  { %173 = vsyncadd [#allocation6], 4294966784  ;;  %s179_s19 = smov [#allocation8]   ;;  %v50_v0 = vld [vmem:[#allocation2] sm:$0xff]  ;;  %v51_v1 = vld [vmem:[#allocation2 + $0x8] sm:$0xff] }
  0x36   :  { %s68_s20 = sshll.u32 %s179_s19, 4  ;;  %v54_v2 = vld [vmem:[#allocation5] sm:$0xff]  ;;  %52 = vst [vmem:[#allocation8] sm:$0xff] %v50_v0  ;;  %53 = vst [vmem:[#allocation8 + $0x8] sm:$0xff] %v51_v1  ;;  %v55_v3 = vld [vmem:[#allocation5 + $0x8] sm:$0xff]  ;;  %s69_s20 = int_to_ptr.vmem [resolvable:$true] %s68_s20 }
  0x37   :  { %57 = vst [vmem:[#allocation8 + $0x10] sm:$0xff] %v54_v2  ;;  %v56_v4 = vld [vmem:[#allocation5 + $0x10] sm:$0xff]  ;;  %v60_v5 = vld [vmem:[#allocation7] sm:$0xff]  ;;  %58 = vst [vmem:[#allocation8 + $0x18] sm:$0xff] %v55_v3  ;;  %s148_s2 = scalar_lea.vmem %s69_s20, 768  ;;  %p153_p11 = scmp.lt.s32.totalorder %s69_s20, %s69_s20 }
  0x38   :  { %59 = vst [vmem:[#allocation8 + $0x20] sm:$0xff] %v56_v4  ;;  %61 = vst [vmem:[#allocation8 + $0x28] sm:$0xff] %v60_v5  ;;  %p149_p10 = scmp.ne.s32.totalorder %s69_s20, %s148_s2  ;;  %p154_p12 = scmp.lt.s32.totalorder %s148_s2, %s148_s2 }
  0x3a   :  { %p155_p13 = por %p154_p12, %p153_p11 }
  0x3c   :  { %p156_p0 = pnand %p155_p13, %p149_p10 }
  0x3e   :  { %159 = shalt.err (!%p156_p0)
}
  0x3f   :  { %s160_s23 = scalar_lea.hbm %s251_s3, 768 }
  0x40   :  { %p161_p1 = scmp.ne.s32.totalorder %s251_s3, %s160_s23  ;;  %p164_p2 = scmp.lt.u32.totalorder %s160_s23, %s251_s3 }
  0x42   :  { %p166_p3 = pnand %p164_p2, %p161_p1 }
  0x44   :  { %169 = shalt.err (!%p166_p3)
}
  0x45   :  { %71 = dma.vmem_to_hbm [thread:$0]  %s69_s20, 768, %s251_s3, [#allocation4]  }
  0x46   :  { %174 = dma.done.wait [#allocation4], 768  }
  0x47   :  { %175 = vsyncadd [#allocation4], 4294966528 }
  0x48   :  { %75 = vsyncpa [#allocation3], 1 }
  0x49   :  { %76 = vsyncpa [#allocation6], 1 }
  0x4a   :  { %77 = vsyncpa [#allocation4], 1 }

</bundles_post_ra>
